<compile_context>
chip_gen: v5e
topology: v5e:2x2
jax: 0.10.0
libtpu: 0.0.40
codegen_flags: <defaults>
</compile_context>

<pallas_src>
import math

import jax
import jax.numpy as jnp
from jax.experimental import pallas as pl
from jax.experimental.pallas import tpu as pltpu


def _make_gcn_kernel(*, project, resident, tk):
    """Builds the per-(row-tile i, K-tile k) kernel body.

    project  : apply the small W projection in the epilogue
               (out = (adj @ x) @ W + b). When False the feature operand is
               already support = x @ W and the epilogue only adds bias.
    resident : feature operand is fully VMEM-resident; slice the K chunk with
               pl.ds instead of streaming a (tk, F) block per step.
    """

    def kernel(*refs):
        if project:
            adj_ref, feat_ref, w_ref, b_ref, o_ref, acc_ref = refs
        else:
            adj_ref, feat_ref, b_ref, o_ref, acc_ref = refs
        k = pl.program_id(1)

        @pl.when(k == 0)
        def _init():
            acc_ref[...] = jnp.zeros_like(acc_ref)

        if resident:
            start = pl.multiple_of(k * tk, tk)
            feat = feat_ref[pl.ds(start, tk), :]
        else:
            feat = feat_ref[...]

        # Dominant N^2 contraction (bf16 MXU inputs, f32 accumulation).
        acc_ref[...] += jnp.dot(adj_ref[...], feat,
                                preferred_element_type=jnp.float32)

        @pl.when(k == pl.num_programs(1) - 1)
        def _epilogue():
            acc = acc_ref[...]
            if project:
                # Small f32 projection, once per row tile, off the HBM path.
                acc = jnp.dot(acc, w_ref[...],
                              preferred_element_type=jnp.float32)
            o_ref[...] = (acc + b_ref[...]).astype(o_ref.dtype)

    return kernel


def _round_up(v, m):
    return (v + m - 1) // m * m


def _pick_tile(n_p, desired):
    """Largest multiple of 128 that divides n_p and is <= desired (>=128)."""
    best = 128
    t = 128
    while t <= min(desired, n_p):
        if n_p % t == 0:
            best = t
        t += 128
    return best


def _pad2(a, rows, cols, dtype):
    """Cast (first, to halve pad traffic) then zero-pad to (rows, cols)."""
    if a.dtype != dtype:
        a = a.astype(dtype)
    pr, pc = rows - a.shape[0], cols - a.shape[1]
    if pr or pc:
        a = jnp.pad(a, ((0, pr), (0, pc)))
    return a


def graph_convolution(x, adj, weight, bias=None, *, tm=512, tk=512,
                      compute_dtype=jnp.bfloat16):
    """GCN forward: adj @ (x @ weight) + bias.

    x      : [N, F_in]   node features
    adj    : [N, N]      dense (row-normalized) adjacency
    weight : [F_in, F_out]
    bias   : [F_out] or None
    """
    n, f_in = x.shape
    f_in_w, f_out = weight.shape
    assert f_in_w == f_in, "weight rows must match input features"
    assert adj.shape == (n, n), "adjacency must be [N, N]"

    # Pick association so the inner feature width is min(F_in, F_out).
    project = f_in <= f_out

    n_p = _round_up(n, 128)
    fi_p = _round_up(f_in, 128)
    fo_p = _round_up(f_out, 128)
    f_mid_p = fi_p if project else fo_p

    # Tiles: multiples of 128 dividing n_p (no extra padding); keep >= 2 row
    # tiles when the graph allows it so the parallel axis shards across 2 TCs.
    tm_cap = tm if n_p < 256 else min(tm, n_p // 2)
    tm = _pick_tile(n_p, tm_cap)
    tk = _pick_tile(n_p, tk)

    bytes_c = jnp.dtype(compute_dtype).itemsize
    # Keep the feature operand fully VMEM-resident when small enough: it is
    # then DMA'd once in total instead of once per row tile.
    resident = 2 * n_p * f_mid_p * bytes_c <= 16 * 1024 * 1024

    adj_p = _pad2(adj, n_p, n_p, compute_dtype)
    if project:
        feat_p = _pad2(x, n_p, fi_p, compute_dtype)
    else:
        # Contracting layer: tiny prologue support = x @ W (kept in XLA).
        support = jnp.dot(x, weight, preferred_element_type=jnp.float32)
        feat_p = _pad2(support, n_p, fo_p, compute_dtype)
    w_p = _pad2(weight, fi_p, fo_p, jnp.float32)      # f32 epilogue projection
    if bias is None:
        b_p = jnp.zeros((1, fo_p), jnp.float32)
    else:
        b_p = _pad2(bias.reshape(1, f_out), 1, fo_p, jnp.float32)

    grid = (n_p // tm, n_p // tk)  # (row tiles : parallel, K tiles : arbitrary)

    in_specs = [pl.BlockSpec((tm, tk), lambda i, k: (i, k))]          # adj tile
    if resident:
        in_specs.append(pl.BlockSpec((n_p, f_mid_p), lambda i, k: (0, 0)))
    else:
        in_specs.append(pl.BlockSpec((tk, f_mid_p), lambda i, k: (k, 0)))
    operands = [adj_p, feat_p]
    if project:
        in_specs.append(pl.BlockSpec((fi_p, fo_p), lambda i, k: (0, 0)))
        operands.append(w_p)
    in_specs.append(pl.BlockSpec((1, fo_p), lambda i, k: (0, 0)))     # bias row
    operands.append(b_p)

    # VMEM budget (double-buffered inputs/outputs + f32 accumulator), clamped
    # so the same setting stays safe on v7x's 64 MiB VMEM.
    feat_rows = n_p if resident else tk
    est = (2 * tm * tk * bytes_c
           + 2 * feat_rows * f_mid_p * bytes_c
           + 2 * tm * fo_p * 4
           + tm * f_mid_p * 4
           + (2 * fi_p * fo_p * 4 if project else 0)
           + 2 * fo_p * 4)
    vmem_limit = int(min(max(est * 5 // 4, 32 * 1024 * 1024),
                         64 * 1024 * 1024))

    kernel = _make_gcn_kernel(project=project, resident=resident, tk=tk)

    out_p = pl.pallas_call(
        kernel,
        out_shape=jax.ShapeDtypeStruct((n_p, fo_p), jnp.float32),
        grid=grid,
        in_specs=in_specs,
        out_specs=pl.BlockSpec((tm, fo_p), lambda i, k: (i, 0)),
        scratch_shapes=[pltpu.VMEM((tm, f_mid_p), jnp.float32)],
        compiler_params=pltpu.CompilerParams(
            dimension_semantics=("parallel", "arbitrary"),
            vmem_limit_bytes=vmem_limit,
        ),
    )(*operands)

    return out_p[:n, :f_out]


if __name__ == "__main__":
    # Layer-sized demo: N nodes = 256, in_features = 128, out_features = 128.
    N, F_IN, F_OUT = 256, 128, 128

    key = jax.random.PRNGKey(0)
    kx, kadj, kw, kb = jax.random.split(key, 4)

    # Deterministic init mirroring reset_parameters(): U(-stdv, stdv),
    # stdv = 1/sqrt(out_features).
    stdv = 1.0 / (F_OUT ** 0.5)
    weight = jax.random.uniform(kw, (F_IN, F_OUT), jnp.float32, -stdv, stdv)
    bias = jax.random.uniform(kb, (F_OUT,), jnp.float32, -stdv, stdv)

    # Node features + dense row-normalized adjacency with self loops.
    x = jax.random.normal(kx, (N, F_IN), jnp.float32)
    adj_raw = (jax.random.uniform(kadj, (N, N)) < 0.1).astype(jnp.float32)
    adj_raw = adj_raw + jnp.eye(N, dtype=jnp.float32)
    adj = adj_raw / jnp.sum(adj_raw, axis=1, keepdims=True)

    # Plain-JAX reference (original association: adj @ (x @ W) + b).
    ref = adj @ (x @ weight) + bias[None, :]

    # 1) Default path: bf16 MXU inputs, f32 accumulation (fast on all gens).
    out = jax.block_until_ready(graph_convolution(x, adj, weight, bias))
    assert out.shape == (N, F_OUT)
    assert jnp.allclose(out, ref, atol=2e-2, rtol=2e-2)

    # 2) f32 path (tight tolerance).
    out_f32 = jax.block_until_ready(
        graph_convolution(x, adj, weight, bias, compute_dtype=jnp.float32))
    assert jnp.allclose(out_f32, ref, atol=1e-4, rtol=1e-4)

    # 3) Non-tile-aligned, contracting layer (F_OUT < F_IN -> adj@(x@W) path).
    N2, FI2, FO2 = 75, 96, 32
    x2 = jax.random.normal(kx, (N2, FI2), jnp.float32)
    a2 = jax.random.uniform(kadj, (N2, N2), jnp.float32)
    a2 = a2 / jnp.sum(a2, axis=1, keepdims=True)
    w2 = jax.random.uniform(kw, (FI2, FO2), jnp.float32, -stdv, stdv)
    b2 = jax.random.uniform(kb, (FO2,), jnp.float32, -stdv, stdv)
    ref2 = a2 @ (x2 @ w2) + b2[None, :]
    out2 = jax.block_until_ready(
        graph_convolution(x2, a2, w2, b2, compute_dtype=jnp.float32))
    assert out2.shape == (N2, FO2)
    assert jnp.allclose(out2, ref2, atol=1e-4, rtol=1e-4)

    # 4) Expanding layer, no bias (F_IN < F_OUT -> (adj@x)@W epilogue path).
    x3 = jax.random.normal(kx, (N2, 32), jnp.float32)
    w3 = jax.random.uniform(kw, (32, 96), jnp.float32, -stdv, stdv)
    ref3 = a2 @ (x3 @ w3)
    out3 = jax.block_until_ready(
        graph_convolution(x3, a2, w3, None, compute_dtype=jnp.float32))
    assert out3.shape == (N2, 96)
    assert jnp.allclose(out3, ref3, atol=1e-4, rtol=1e-4)

    print("KERNEL_OK")
</pallas_src>

<mosaic_0001>
module attributes {stable_mosaic.version = 11 : i64} {
  func.func @kernel(%arg0: i32, %arg1: i32, %arg2: memref<128x256xbf16, #tpu.memory_space<vmem>>, %arg3: memref<256x128xbf16, #tpu.memory_space<vmem>>, %arg4: memref<128x128xf32, #tpu.memory_space<vmem>>, %arg5: memref<1x128xf32, #tpu.memory_space<vmem>>, %arg6: memref<128x128xf32, #tpu.memory_space<vmem>>, %arg7: memref<128x128xf32, #tpu.memory_space<vmem>>) attributes {dimension_semantics = [#tpu.dimension_semantics<parallel>, #tpu.dimension_semantics<arbitrary>], iteration_bounds = array<i64: 2, 1>, scalar_prefetch = 0 : i64, scratch_operands = 1 : i64, tpu.core_type = #tpu.core_type<tc>, window_params = [{transform_indices = @transform_0, window_bounds = array<i64: 128, 256>}, {pipeline_mode = #tpu.pipeline_mode<synchronous>, transform_indices = @transform_1, window_bounds = array<i64: 256, 128>}, {pipeline_mode = #tpu.pipeline_mode<synchronous>, transform_indices = @transform_2, window_bounds = array<i64: 128, 128>}, {pipeline_mode = #tpu.pipeline_mode<synchronous>, transform_indices = @transform_3, window_bounds = array<i64: 1, 128>}, {transform_indices = @transform_4, window_bounds = array<i64: 128, 128>}]} {
    %c0_i32 = arith.constant 0 : i32
    %0 = arith.cmpi eq, %arg1, %c0_i32 : i32
    %1 = arith.extui %0 : i1 to i32
    %c0_i32_0 = arith.constant 0 : i32
    %2 = arith.cmpi ne, %1, %c0_i32_0 : i32
    scf.if %2 {
      %cst_9 = arith.constant 0.000000e+00 : f32
      %15 = vector.broadcast %cst_9 : f32 to vector<128x128xf32>
      %c0_10 = arith.constant 0 : index
      %c0_11 = arith.constant 0 : index
      %16 = vector.load %arg7[%c0_10, %c0_11] : memref<128x128xf32, #tpu.memory_space<vmem>>, vector<128x128xf32>
      tpu.vector_store %arg7[%c0_10, %c0_11], %15 {strides = array<i32>} : memref<128x128xf32, #tpu.memory_space<vmem>>, vector<128x128xf32>,
    } else {
    }
    %c256_i32 = arith.constant 256 : i32
    %3 = arith.muli %arg1, %c256_i32 : i32
    %4 = tpu.assume_multiple %3, 256 : i32
    %5 = arith.index_cast %4 : i32 to index
    %c0 = arith.constant 0 : index
    %6 = vector.load %arg3[%5, %c0] : memref<256x128xbf16, #tpu.memory_space<vmem>>, vector<256x128xbf16>
    %c0_1 = arith.constant 0 : index
    %c0_2 = arith.constant 0 : index
    %7 = vector.load %arg7[%c0_1, %c0_2] : memref<128x128xf32, #tpu.memory_space<vmem>>, vector<128x128xf32>
    %c0_3 = arith.constant 0 : index
    %c0_4 = arith.constant 0 : index
    %8 = vector.load %arg2[%c0_3, %c0_4] : memref<128x256xbf16, #tpu.memory_space<vmem>>, vector<128x256xbf16>
    %cst = arith.constant dense<0.000000e+00> : vector<128x128xf32>
    %9 = tpu.matmul %8, %6, %cst {dimension_numbers = #tpu.dot_dimension_numbers<[1], [0], [0], [1], [0, 0, 1, 1], [], []>} : vector<128x256xbf16>, vector<256x128xbf16>, vector<128x128xf32> -> vector<128x128xf32>
    %10 = arith.addf %7, %9 : vector<128x128xf32>
    %c0_5 = arith.constant 0 : index
    %c0_6 = arith.constant 0 : index
    %11 = vector.load %arg7[%c0_5, %c0_6] : memref<128x128xf32, #tpu.memory_space<vmem>>, vector<128x128xf32>
    tpu.vector_store %arg7[%c0_5, %c0_6], %10 {strides = array<i32>} : memref<128x128xf32, #tpu.memory_space<vmem>>, vector<128x128xf32>,
    %c0_i32_7 = arith.constant 0 : i32
    %12 = arith.cmpi eq, %arg1, %c0_i32_7 : i32
    %13 = arith.extui %12 : i1 to i32
    %c0_i32_8 = arith.constant 0 : i32
    %14 = arith.cmpi ne, %13, %c0_i32_8 : i32
    scf.if %14 {
      %c0_9 = arith.constant 0 : index
      %c0_10 = arith.constant 0 : index
      %15 = vector.load %arg7[%c0_9, %c0_10] : memref<128x128xf32, #tpu.memory_space<vmem>>, vector<128x128xf32>
      %c0_11 = arith.constant 0 : index
      %c0_12 = arith.constant 0 : index
      %16 = vector.load %arg4[%c0_11, %c0_12] : memref<128x128xf32, #tpu.memory_space<vmem>>, vector<128x128xf32>
      %cst_13 = arith.constant dense<0.000000e+00> : vector<128x128xf32>
      %17 = tpu.matmul %15, %16, %cst_13 {dimension_numbers = #tpu.dot_dimension_numbers<[1], [0], [0], [1], [0, 0, 1, 1], [], []>} : vector<128x128xf32>, vector<128x128xf32>, vector<128x128xf32> -> vector<128x128xf32>
      %c0_14 = arith.constant 0 : index
      %c0_15 = arith.constant 0 : index
      %18 = vector.load %arg5[%c0_14, %c0_15] : memref<1x128xf32, #tpu.memory_space<vmem>>, vector<1x128xf32>
      %19 = vector.broadcast %18 : vector<1x128xf32> to vector<128x128xf32>
      %20 = arith.addf %17, %19 : vector<128x128xf32>
      %c0_16 = arith.constant 0 : index
      %c0_17 = arith.constant 0 : index
      %21 = vector.load %arg6[%c0_16, %c0_17] : memref<128x128xf32, #tpu.memory_space<vmem>>, vector<128x128xf32>
      tpu.vector_store %arg6[%c0_16, %c0_17], %20 {strides = array<i32>} : memref<128x128xf32, #tpu.memory_space<vmem>>, vector<128x128xf32>,
    } else {
    }
    return
  }
  func.func @transform_0(%arg0: i32, %arg1: i32) -> (i32, i32) {
    %c0_i32 = arith.constant 0 : i32
    return %arg0, %arg1 : i32, i32
  }
  func.func @transform_1(%arg0: i32, %arg1: i32) -> (i32, i32) {
    %c0_i32 = arith.constant 0 : i32
    %c0_i32_0 = arith.constant 0 : i32
    %c0_i32_1 = arith.constant 0 : i32
    return %c0_i32, %c0_i32_0 : i32, i32
  }
  func.func @transform_2(%arg0: i32, %arg1: i32) -> (i32, i32) {
    %c0_i32 = arith.constant 0 : i32
    %c0_i32_0 = arith.constant 0 : i32
    %c0_i32_1 = arith.constant 0 : i32
    return %c0_i32, %c0_i32_0 : i32, i32
  }
  func.func @transform_3(%arg0: i32, %arg1: i32) -> (i32, i32) {
    %c0_i32 = arith.constant 0 : i32
    %c0_i32_0 = arith.constant 0 : i32
    %c0_i32_1 = arith.constant 0 : i32
    return %c0_i32, %c0_i32_0 : i32, i32
  }
  func.func @transform_4(%arg0: i32, %arg1: i32) -> (i32, i32) {
    %c0_i32 = arith.constant 0 : i32
    %c0_i32_0 = arith.constant 0 : i32
    return %arg0, %c0_i32 : i32, i32
  }
}

</mosaic_0001>

<bundles_post_ra>
// kernel: tpu_custom_call.1
= control target key start
LH: loop header
LB: loop body
LE: loop exit
PB: predicated region body
PF: predicated region fallthrough
CT: control target
= control target key end

     0   :  { %s1635_s0 = inlined_call_operand.hbm [shape: bf16[256,256], index: 0, kind: input, shape index: {}]   ;;  %s1636_s1 = inlined_call_operand.hbm [shape: bf16[256,128], index: 1, kind: input, shape index: {}]   ;;  %s1637_s2 = inlined_call_operand.hbm [shape: f32[128,128], index: 2, kind: input, shape index: {}]   ;;  %s1638_s3 = inlined_call_operand.vmem [shape: f32[1,128], index: 3, kind: input, shape index: {}]   ;;  %s1639_s4 = inlined_call_operand.hbm [shape: f32[256,128], index: 4, kind: output, shape index: {}]  }
   0x1   :  { %1641 = sst [smem:[#allocation13_spill]] %s1636_s1 }
   0x2   :  { %9 = vsyncpa [#allocation4], 0 }
   0x3   :  { %11 = vsyncpa [#allocation4 + $0x1], 0 }
   0x4   :  { %12 = vsyncpa [#allocation7], 0 }
   0x5   :  { %13 = vsyncpa [#allocation5], 0 }
   0x6   :  { %15 = vsyncpa [#allocation5 + $0x1], 0  ;;  %s1423_s15 = smov 0   ;;  %s1425_s16 = smov 0  }
   0x7   :  { %s1427_s17 = smov 0   ;;  %s1429_s18 = smov 0  }
   0x8   :  { %s1431_s19 = smov 0   ;;  %s1433_s20 = smov 0  }
   0x9 LB: > { %s907_s21 = sadd.s32 4294967295, %s1388_s20   ;;  %s908_s22 = sadd.s32 4294967294, %s1388_s20   ;;  %s1388_s20 = sphi %s1433_s20, %s21_s20   ;;  %s1384_s19 = sphi %s1431_s19, %s1653_s19   ;;  %s1380_s18 = sphi %s1429_s18, %s1652_s18   ;;  %s1376_s17 = sphi %s1427_s17, %s1651_s17   ;;  %s1372_s16 = sphi %s1425_s16, %s1650_s16   ;;  %s1368_s15 = sphi %s1423_s15, %s1649_s15  }
   0xa   : > { %p55_p0 = scmp.ne.s32.totalorder %s1372_s16, %s1368_s15  ;;  %p1459_p1 = scmp.eq.s32.totalorder %s907_s21, 0 }
   0xb   : > { %p148_p2 = scmp.eq.s32.totalorder %s908_s22, 1  ;;  %p909_p4 = scmp.ge.s32.totalorder %s1388_s20, 1 }
   0xc   : > { %p1465_p3 = por %p1459_p1, %p55_p0  ;;  %p155_p6 = scmp.lt.s32.totalorder %s1388_s20, 3 }
   0xd   : > { %p1470_p5 = por %p148_p2, %p55_p0  ;;  %s1645_s1 = sld [smem:[#allocation13_spill]] }
   0xe   : > { %p1478_p7 = pnand %p909_p4, %p155_p6  ;;  %s1390_s30 = smov [#allocation6]  }
   0xf   : > { %s168_s5 = sshll.u32 %s1390_s30, 4  ;;  %p912_p10 = scmp.ge.s32.totalorder %s1388_s20, 2  ;;  %s169_s5 = int_to_ptr.vmem [resolvable:$true] %s168_s5 }
  0x10   : > { %p1134_p8 = pneg %p1478_p7  ;;  %s180_s8 = sshll.u32 %s1637_s2, 4  ;;  %s181_s8 = int_to_ptr.hbm [resolvable:$true] %s180_s8 }
  0x11   : > { %s1391_s9 = smov 64   ;;  %s1392_s10 = smov 4  }
  0x12   : > { %p1135_p9 = pnand %p1134_p8, %p1459_p1  ;;  %s1393_s11 = smov [#allocation8]  }
  0x13   : > { %s166_s28 = sshll.u32 %s1645_s1, 4  ;;  %s182_s12 = sshll.u32 %s1393_s11, 4  ;;  %s167_s28 = int_to_ptr.hbm [resolvable:$true] %s166_s28  ;;  %s183_s12 = int_to_ptr.vmem [resolvable:$true] %s182_s12 }
  0x14   : > { %1137 = dma.hbm_to_vmem [thread:$0]  (!%p1135_p9), %s167_s28, 2048, %s169_s5, [#allocation7], %s1391_s9, %s1391_s9, %s1392_s10  }
  0x15   : > { %s1640_s13 = smov 128   ;;  %s1395_s14 = smov 8  }
  0x16   : > { %1140 = dma.hbm_to_vmem [thread:$0]  (!%p1135_p9), %s181_s8, 2048, %s183_s12, [#allocation7], %s1640_s13, %s1640_s13, %s1395_s14  }
  0x17   : > { %p142_p11 = scmp.eq.s32.totalorder %s907_s21, 1  ;;  %s33_s22 = sadd.s32 1, %s1384_s19 }
  0x18   : > { %p35_p12 = scmp.ge.s32.totalorder %s33_s22, 2  ;;  %s42_s26 = sadd.s32 1, %s1376_s17 }
  0x19   : > { %p49_p13 = scmp.ne.s32.totalorder %s1376_s17, %s1372_s16  ;;  %p50_p0 = scmp.eq.s32.totalorder %s1388_s20, 0 }
  0x1a   : > { %s1655_s22 = smov (%p35_p12, %s33_s22), 0  ;;  %p1151_p4 = scmp.lt.s32.totalorder %s1388_s20, 2 }
  0x1b   : > { %p1502_p2 = por %p142_p11, %p49_p13  ;;  %s37_s28 = ssub.s32 %s1384_s19, %s1655_s22 }
  0x1c   : > { %s199_s30 = sand.u32 1, %s1376_s17   ;;  %p40_p6 = scmp.eq.s32.totalorder %s37_s28, 0 }
  0x1d   : > { %p51_p8 = por %p50_p0, %p49_p13  ;;  %s913_s5 = sshll.u32 %s199_s30, 7 }
  0x1e   : > { %s1056_s21 = sshll.u32 %s1384_s19, 7  ;;  %s203_s11 = scalar_lea.vmem [#allocation3], %s913_s5 }
  0x1f   : > { %s1512_s6 = scalar_select %p40_p6, %s1376_s17, %s42_s26  }
  0x20   : > { %s211_s9 = scalar_lea.hbm %s1635_s0, %s1056_s21  ;;  %s214_s12 = sshll.u32 %s203_s11, 4  ;;  %s215_s12 = int_to_ptr.vmem [resolvable:$true] %s214_s12 }
  0x21   : > { %s212_s10 = sshll.u32 %s211_s9, 4  ;;  %p1142_p9 = pnand %p1151_p4, %p51_p8  ;;  %s213_s10 = int_to_ptr.hbm [resolvable:$true] %s212_s10 }
  0x22   : > { %s200_s13 = scalar_lea.sflag [#allocation4], %s199_s30  ;;  %s1648_s1 = smov 128  }
  0x23   : > { %1144 = dma.hbm_to_vmem [thread:$0]  (!%p1142_p9), %s213_s10, 2048, %s215_s12, %s200_s13, %s1648_s1, %s1648_s1, %s1395_s14  }
  0x24   : > { %226 = sbr.rel (%p1478_p7) target bundleno = 431 (0x1af), region = 36  ;;  %s1525_s26 = sand.u32 (!%p1478_p7), 1, %s1372_s16  }
  0x25   : > { %s918_s28 = sshll.u32 (!%p1478_p7), %s1525_s26, 7  ;;  %s229_s5 = scalar_lea.sflag (!%p1478_p7), [#allocation4], %s1525_s26 }
  0x26   : > { %s1531_s21 = scalar_lea.vmem (!%p1478_p7), [#allocation3], %s918_s28 }
  0x29   : > { %1355 = dma.done.wait (%p1465_p3), %s229_s5, 2048  }
  0x2a   : > { %1357 = vsyncadd (%p1465_p3), %s229_s5, 4294965248 }
  0x2b   : > { %1359 = dma.done.wait (%p1459_p1), [#allocation7], 4096  }
  0x2c   : > { %1361 = vsyncadd (%p1459_p1), [#allocation7], 4294963200  ;;  %v1064_v0 = vld [vmem:[#allocation6 + $0x38] sm:$0xff]  ;;  %v1063_v2 = vld [vmem:[#allocation6 + $0x30] sm:$0xff]  ;;  %s1578_s24 = scalar_lea.vmem [#allocation9], %s918_s28  ;;  %s1089_s29 = sshll.u32 %s1380_s18, 7 }
  0x2d   : > { %v1072_v1 = vld [vmem:[#allocation6 + $0x78] sm:$0xff]  ;;  %536 = vmatpush.bf16.msra.mxu0 %v1064_v0  ;;  %1090 = vmatpush.bf16.msra.mxu3 %v1064_v0  ;;  %v1071_v3 = vld [vmem:[#allocation6 + $0x70] sm:$0xff]  ;;  %v1062_v4 = vld [vmem:[#allocation6 + $0x28] sm:$0xff]  ;;  %s798_s30 = scalar_lea.hbm %s1639_s4, %s1089_s29  ;;  %s799_s7 = sshll.u32 %s1578_s24, 4  ;;  %s800_s7 = int_to_ptr.vmem [resolvable:$true] %s799_s7 }
  0x2e   : > { %585 = vmatpush.bf16.msra.mxu1 %v1072_v1  ;;  %v1070_v5 = vld [vmem:[#allocation6 + $0x68] sm:$0xff]  ;;  %v1061_v6 = vld [vmem:[#allocation6 + $0x20] sm:$0xff]  ;;  %v1060_v8 = vld [vmem:[#allocation6 + $0x18] sm:$0xff]  ;;  %s801_s8 = sshll.u32 %s798_s30, 4  ;;  %s787_s9 = scalar_lea.sflag [#allocation5], %s1525_s26  ;;  %s802_s8 = int_to_ptr.hbm [resolvable:$true] %s801_s8 }
  0x2f   : > { %v1069_v7 = vld [vmem:[#allocation6 + $0x60] sm:$0xff]  ;;  %v1068_v9 = vld [vmem:[#allocation6 + $0x58] sm:$0xff]  ;;  %v1059_v10 = vld [vmem:[#allocation6 + $0x10] sm:$0xff]  ;;  %s1316_s10 = sshra.s32 %s802_s8, 4  ;;  %s1322_s28 = scalar_lea.hbm %s1639_s4, 256  ;;  %s1317_s10 = int_to_ptr.hbm [resolvable:$true] %s1316_s10 }
  0x30   : > { %v1067_v11 = vld [vmem:[#allocation6 + $0x50] sm:$0xff]  ;;  %v1058_v12 = vld [vmem:[#allocation6 + $0x8] sm:$0xff]  ;;  %v1057_v14 = vld [vmem:[#allocation6] sm:$0xff]  ;;  %s1318_s11 = scalar_lea.hbm %s1317_s10, 128  ;;  %p1323_p11 = scmp.lt.s32.totalorder %s1317_s10, %s1639_s4 }
  0x31   : > { %537 = vmatpush.bf16.msra.mxu0 %v1063_v2  ;;  %1091 = vmatpush.bf16.msra.mxu3 %v1063_v2  ;;  %v1066_v13 = vld [vmem:[#allocation6 + $0x48] sm:$0xff]  ;;  %v924_v15 = vld [vmem:[%s1531_s21] sm:$0xf]  ;;  %v1073_v20 = vld [vmem:[%s1531_s21 + $0x4] sm:$0xf]  ;;  %p1319_p1 = scmp.ne.s32.totalorder %s1317_s10, %s1318_s11  ;;  %p1324_p12 = scmp.lt.s32.totalorder %s1322_s28, %s1318_s11 }
  0x32   : > { %586 = vmatpush.bf16.msra.mxu1 %v1071_v3  ;;  %v1074_v16 = vld [vmem:[%s1531_s21 + $0x4] sm:$0xf0]  ;;  %v972_v17 = vld [vmem:[%s1531_s21 + $0x60] sm:$0xf]  ;;  %v926_v21 = vld [vmem:[%s1531_s21 + $0x8] sm:$0xf0] }
  0x33   : > { %v1086_v18 = vld [vmem:[%s1531_s21 + $0x64] sm:$0xf0]  ;;  %v1065_v19 = vld [vmem:[#allocation6 + $0x40] sm:$0xff]  ;;  %v925_v22 = vor.u32 %v1074_v16, %v924_v15  ;;  %v929_v24 = vor.u32 %v1073_v20, %v926_v21  ;;  %v932_v25 = vld [vmem:[%s1531_s21 + $0x10] sm:$0xf]  ;;  %p1320_p3 = pnand %p1319_p1, %p1502_p2  ;;  %p1325_p13 = por %p1324_p12, %p1323_p11 }
  0x34   : > { %v973_v23 = vor.u32 %v1086_v18, %v972_v17  ;;  %v1076_v26 = vld [vmem:[%s1531_s21 + $0x14] sm:$0xf0]  ;;  %v980_v27 = vld [vmem:[%s1531_s21 + $0x70] sm:$0xf]  ;;  %v1075_v29 = vld [vmem:[%s1531_s21 + $0x14] sm:$0xf] }
  0x35   : > { %538 = vmatpush.bf16.msra.mxu0 %v1062_v4  ;;  %1092 = vmatpush.bf16.msra.mxu3 %v1062_v4  ;;  %v1088_v28 = vld [vmem:[%s1531_s21 + $0x74] sm:$0xf0]  ;;  %v934_v30 = vld [vmem:[%s1531_s21 + $0x18] sm:$0xf0]  ;;  %v933_v31 = vor.u32 %v1076_v26, %v932_v25  ;;  %v940_v34 = vld [vmem:[%s1531_s21 + $0x20] sm:$0xf]  ;;  %p1321_p7 = pneg %p1320_p3 }
  0x36   : > { %587 = vmatpush.bf16.msra.mxu1 %v1070_v5  ;;  %v981_v32 = vor.u32 %v1088_v28, %v980_v27  ;;  %v937_v33 = vor.u32 %v1075_v29, %v934_v30  ;;  %v1078_v35 = vld [vmem:[%s1531_s21 + $0x24] sm:$0xf0]  ;;  %v1085_v36 = vld [vmem:[%s1531_s21 + $0x64] sm:$0xf]  ;;  %v974_v37 = vld [vmem:[%s1531_s21 + $0x68] sm:$0xf0] }
  0x37   : > { %v1077_v38 = vld [vmem:[%s1531_s21 + $0x24] sm:$0xf]  ;;  %v942_v39 = vld [vmem:[%s1531_s21 + $0x28] sm:$0xf0]  ;;  %v941_v40 = vor.u32 %v1078_v35, %v940_v34  ;;  %v977_v41 = vor.u32 %v1085_v36, %v974_v37  ;;  %v948_v43 = vld [vmem:[%s1531_s21 + $0x30] sm:$0xf]  ;;  %p1326_p0 = pnand %p1325_p13, %p1321_p7 }
  0x38   : > { %v945_v42 = vor.u32 %v1077_v38, %v942_v39  ;;  %v1080_v44 = vld [vmem:[%s1531_s21 + $0x34] sm:$0xf0]  ;;  %v1087_v45 = vld [vmem:[%s1531_s21 + $0x74] sm:$0xf]  ;;  %v982_v46 = vld [vmem:[%s1531_s21 + $0x78] sm:$0xf0] }
  0x39   : > { %539 = vmatpush.bf16.msra.mxu0 %v1061_v6  ;;  %1093 = vmatpush.bf16.msra.mxu3 %v1061_v6  ;;  %v1079_v47 = vld [vmem:[%s1531_s21 + $0x34] sm:$0xf]  ;;  %v950_v48 = vld [vmem:[%s1531_s21 + $0x38] sm:$0xf0]  ;;  %v949_v49 = vor.u32 %v1080_v44, %v948_v43  ;;  %v985_v50 = vor.u32 %v1087_v45, %v982_v46  ;;  %v698_v54 = vld [vmem:[#allocation8 + $0x68] sm:$0xff] }
  0x3a   : > { %588 = vmatpush.bf16.msra.mxu1 %v1069_v7  ;;  %v953_v51 = vor.u32 %v1079_v47, %v950_v48  ;;  %v700_v52 = vld [vmem:[#allocation8 + $0x78] sm:$0xff]  ;;  %v699_v53 = vld [vmem:[#allocation8 + $0x70] sm:$0xff]  ;;  %v697_v55 = vld [vmem:[#allocation8 + $0x60] sm:$0xff] }
  0x3b   : > { %705 = vmatpush.msra.mxu2 %v700_v52  ;;  %v696_v56 = vld [vmem:[#allocation8 + $0x58] sm:$0xff]  ;;  %v956_v57 = vld [vmem:[%s1531_s21 + $0x40] sm:$0xf]  ;;  %v1082_v58 = vld [vmem:[%s1531_s21 + $0x44] sm:$0xf0] }
  0x3c   : > { %v695_v59 = vld [vmem:[#allocation8 + $0x50] sm:$0xff]  ;;  %v1081_v60 = vld [vmem:[%s1531_s21 + $0x44] sm:$0xf]  ;;  %v958_v61 = vld [vmem:[%s1531_s21 + $0x48] sm:$0xf0]  ;;  %v957_v63 = vor.u32 %v1082_v58, %v956_v57 }
  0x3d   : > { %540 = vmatpush.bf16.msra.mxu0 %v1060_v8  ;;  %1094 = vmatpush.bf16.msra.mxu3 %v1060_v8  ;;  %v694_v62 = vld [vmem:[#allocation8 + $0x48] sm:$0xff]  ;;  %v961_v0 = vor.u32 %v1081_v60, %v958_v61  ;;  %v692_v2 = vld [vmem:[#allocation8 + $0x38] sm:$0xff]  ;;  %v685_v15 = vld [vmem:[#allocation8] sm:$0xff] }
  0x3e   : > { %589 = vmatpush.bf16.msra.mxu1 %v1068_v9  ;;  %706 = vmatpush.msra.mxu2 %v699_v53  ;;  %v690_v4 = vld [vmem:[#allocation8 + $0x28] sm:$0xff]  ;;  %v688_v6 = vld [vmem:[#allocation8 + $0x18] sm:$0xff] }
  0x3f   : > { %v1084_v8 = vld [vmem:[%s1531_s21 + $0x54] sm:$0xf0] }
  0x40   : > { %707 = vmatpush.msra.mxu2 %v698_v54 }
  0x41   : > { %541 = vmatpush.bf16.msra.mxu0 %v1059_v10  ;;  %1095 = vmatpush.bf16.msra.mxu3 %v1059_v10  ;;  %v1083_v10 = vld [vmem:[%s1531_s21 + $0x54] sm:$0xf] }
  0x42   : > { %590 = vmatpush.bf16.msra.mxu1 %v1067_v11  ;;  %708 = vmatpush.msra.mxu2 %v697_v55 }
  0x44   : > { %709 = vmatpush.msra.mxu2 %v696_v56 }
  0x45   : > { %542 = vmatpush.bf16.msra.mxu0 %v1058_v12  ;;  %1096 = vmatpush.bf16.msra.mxu3 %v1058_v12 }
  0x46   : > { %591 = vmatpush.bf16.msra.mxu1 %v1066_v13  ;;  %710 = vmatpush.msra.mxu2 %v695_v59 }
  0x48   : > { %711 = vmatpush.msra.mxu2 %v694_v62 }
  0x49   : > { %543 = vmatpush.bf16.msra.mxu0 %v1057_v14  ;;  %1097 = vmatpush.bf16.msra.mxu3 %v1057_v14  ;;  %v686_v14 = vld [vmem:[#allocation8 + $0x8] sm:$0xff] }
  0x4a   : > { %592 = vmatpush.bf16.msra.mxu1 %v1065_v19 }
  0x4c   : > { %544 = vmatmul.bf16.vlgmr.msra.gmra.mxu0 %v925_v22  ;;  %574 = vmatmul.bf16.vlgmr.msra.gmra.mxu3 %v973_v23 }
  0x4d   : > { %1098 = vmatpush.bf16.msrb.mxu3 %v1072_v1  ;;  %593 = vmatmul.bf16.vlgmr.msra.gmra.mxu1 %v929_v24  ;;  %v693_v1 = vld [vmem:[#allocation8 + $0x40] sm:$0xff] }
  0x4e   : > { %712 = vmatpush.msra.mxu2 %v693_v1 }
  0x50   : > { %713 = vmatpush.msra.mxu2 %v692_v2 }
  0x51   : > { %1099 = vmatpush.bf16.msrb.mxu3 %v1071_v3  ;;  %v691_v3 = vld [vmem:[#allocation8 + $0x30] sm:$0xff] }
  0x52   : > { %714 = vmatpush.msra.mxu2 %v691_v3 }
  0x54   : > { %715 = vmatpush.msra.mxu2 %v690_v4 }
  0x55   : > { %1100 = vmatpush.bf16.msrb.mxu3 %v1070_v5  ;;  %v689_v5 = vld [vmem:[#allocation8 + $0x20] sm:$0xff] }
  0x56   : > { %716 = vmatpush.msra.mxu2 %v689_v5 }
  0x58   : > { %717 = vmatpush.msra.mxu2 %v688_v6 }
  0x59   : > { %1101 = vmatpush.bf16.msrb.mxu3 %v1069_v7  ;;  %v964_v7 = vld [vmem:[%s1531_s21 + $0x50] sm:$0xf] }
  0x5a   : > { %v965_v12 = vor.u32 %v1084_v8, %v964_v7 }
  0x5c   : > { %549 = vmatmul.bf16.gmra.mxu0 %v933_v31  ;;  %579 = vmatmul.bf16.gmra.mxu3 %v981_v32 }
  0x5d   : > { %1102 = vmatpush.bf16.msrb.mxu3 %v1068_v9  ;;  %598 = vmatmul.bf16.gmra.mxu1 %v937_v33  ;;  %v687_v9 = vld [vmem:[#allocation8 + $0x10] sm:$0xff] }
  0x5e   : > { %718 = vmatpush.msra.mxu2 %v687_v9 }
  0x60   : > { %719 = vmatpush.msra.mxu2 %v686_v14 }
  0x61   : > { %1103 = vmatpush.bf16.msrb.mxu3 %v1067_v11  ;;  %v966_v11 = vld [vmem:[%s1531_s21 + $0x58] sm:$0xf0] }
  0x62   : > { %720 = vmatpush.msra.mxu2 %v685_v15 }
  0x65   : > { %1104 = vmatpush.bf16.msrb.mxu3 %v1066_v13  ;;  %v969_v13 = vor.u32 %v1083_v10, %v966_v11 }
  0x69   : > { %1105 = vmatpush.bf16.msrb.mxu3 %v1065_v19 }
  0x6c   : > { %554 = vmatmul.bf16.gmra.mxu0 %v941_v40  ;;  %623 = vmatmul.bf16.vlgmr.msrb.gmra.mxu3 %v977_v41 }
  0x6d   : > { %603 = vmatmul.bf16.gmra.mxu1 %v945_v42  ;;  %1106 = vmatpush.msra.mxu3 %v700_v52 }
  0x6f   : > { %1107 = vmatpush.msra.mxu3 %v699_v53 }
  0x71   : > { %1108 = vmatpush.msra.mxu3 %v698_v54 }
  0x73   : > { %1109 = vmatpush.msra.mxu3 %v697_v55 }
  0x75   : > { %1110 = vmatpush.msra.mxu3 %v696_v56 }
  0x77   : > { %1111 = vmatpush.msra.mxu3 %v695_v59 }
  0x79   : > { %1112 = vmatpush.msra.mxu3 %v694_v62 }
  0x7b   : > { %1113 = vmatpush.msra.mxu3 %v693_v1 }
  0x7c   : > { %559 = vmatmul.bf16.gmra.mxu0 %v949_v49  ;;  %628 = vmatmul.bf16.gmra.mxu3 %v985_v50 }
  0x7d   : > { %608 = vmatmul.bf16.gmra.mxu1 %v953_v51  ;;  %1114 = vmatpush.msra.mxu3 %v692_v2 }
  0x7f   : > { %1115 = vmatpush.msra.mxu3 %v691_v3 }
  0x81   : > { %1116 = vmatpush.msra.mxu3 %v690_v4 }
  0x83   : > { %1117 = vmatpush.msra.mxu3 %v689_v5 }
  0x85   : > { %1118 = vmatpush.msra.mxu3 %v688_v6 }
  0x87   : > { %1119 = vmatpush.msra.mxu3 %v687_v9 }
  0x89   : > { %1120 = vmatpush.msra.mxu3 %v686_v14 }
  0x8b   : > { %1121 = vmatpush.msra.mxu3 %v685_v15 }
  0x8c   : > { %564 = vmatmul.bf16.gmra.mxu0 %v957_v63 }
  0x8d   : > { %613 = vmatmul.bf16.gmra.mxu1 %v961_v0  ;;  %v1211_v0 = vld [vmem:[%s1638_s3] ss:$0 sm:$0xff] }
  0x9c   : > { %569 = vmatmul.bf16.gmra.mxu0 %v965_v12 }
  0x9d   : > { %618 = vmatmul.bf16.gmra.mxu1 %v969_v13 }
  0xc9   : > { %v545_v16 = vpop.f32.mrf.mxu0 }
  0xca   : > { %v594_v17 = vpop.f32.mrf.mxu1 }
  0xcb   : > { %v595_v18 = vadd.f32 %v594_v17, %v545_v16 }
  0xcd   : > { %721 = vmatmul.f32.vlgmr.msra.gmra.mxu2 %v595_v18 }
  0xcf   : > { %v575_v19 = vpop.f32.mrf.mxu3 }
  0xd1   : > { %v547_v20 = vpop.f32.mrf.mxu0 }
  0xd2   : > { %v596_v21 = vpop.f32.mrf.mxu1 }
  0xd3   : > { %v597_v22 = vadd.f32 %v596_v21, %v547_v20 }
  0xd5   : > { %724 = vmatmul.f32.gmra.mxu2 %v597_v22 }
  0xd7   : > { %v577_v23 = vpop.f32.mrf.mxu3 }
  0xd9   : > { %v550_v24 = vpop.f32.mrf.mxu0 }
  0xda   : > { %v599_v25 = vpop.f32.mrf.mxu1 }
  0xdb   : > { %v600_v26 = vadd.f32 %v599_v25, %v550_v24 }
  0xdd   : > { %727 = vmatmul.f32.gmra.mxu2 %v600_v26 }
  0xdf   : > { %v580_v27 = vpop.f32.mrf.mxu3 }
  0xe1   : > { %v552_v28 = vpop.f32.mrf.mxu0 }
  0xe2   : > { %v601_v29 = vpop.f32.mrf.mxu1 }
  0xe3   : > { %v602_v30 = vadd.f32 %v601_v29, %v552_v28 }
  0xe5   : > { %730 = vmatmul.f32.gmra.mxu2 %v602_v30 }
  0xe7   : > { %v582_v31 = vpop.f32.mrf.mxu3 }
  0xe9   : > { %v555_v32 = vpop.f32.mrf.mxu0 }
  0xea   : > { %v604_v33 = vpop.f32.mrf.mxu1 }
  0xeb   : > { %v605_v34 = vadd.f32 %v604_v33, %v555_v32 }
  0xed   : > { %733 = vmatmul.f32.gmra.mxu2 %v605_v34 }
  0xef   : > { %v624_v35 = vpop.f32.mrf.mxu3 }
  0xf0   : > { %v625_v36 = vadd.f32 %v624_v35, %v575_v19 }
  0xf1   : > { %v557_v37 = vpop.f32.mrf.mxu0 }
  0xf2   : > { %v606_v38 = vpop.f32.mrf.mxu1  ;;  %757 = vmatmul.f32.vlgmr.msra.gmra.mxu3 %v625_v36 }
  0xf3   : > { %v607_v39 = vadd.f32 %v606_v38, %v557_v37 }
  0xf5   : > { %736 = vmatmul.f32.gmra.mxu2 %v607_v39 }
  0xf7   : > { %v626_v40 = vpop.f32.mrf.mxu3 }
  0xf8   : > { %v627_v41 = vadd.f32 %v626_v40, %v577_v23 }
  0xf9   : > { %v560_v42 = vpop.f32.mrf.mxu0 }
  0xfa   : > { %v609_v43 = vpop.f32.mrf.mxu1  ;;  %760 = vmatmul.f32.gmra.mxu3 %v627_v41 }
  0xfb   : > { %v610_v44 = vadd.f32 %v609_v43, %v560_v42 }
  0xfd   : > { %739 = vmatmul.f32.gmra.mxu2 %v610_v44 }
  0xff   : > { %v629_v45 = vpop.f32.mrf.mxu3 }
 0x100   : > { %v630_v46 = vadd.f32 %v629_v45, %v580_v27 }
 0x101   : > { %v562_v47 = vpop.f32.mrf.mxu0 }
 0x102   : > { %v611_v48 = vpop.f32.mrf.mxu1  ;;  %763 = vmatmul.f32.gmra.mxu3 %v630_v46 }
 0x103   : > { %v612_v49 = vadd.f32 %v611_v48, %v562_v47 }
 0x105   : > { %742 = vmatmul.f32.gmra.mxu2 %v612_v49 }
 0x107   : > { %v631_v50 = vpop.f32.mrf.mxu3 }
 0x108   : > { %v632_v51 = vadd.f32 %v631_v50, %v582_v31 }
 0x109   : > { %v565_v52 = vpop.f32.mrf.mxu0 }
 0x10a   : > { %v614_v53 = vpop.f32.mrf.mxu1  ;;  %766 = vmatmul.f32.gmra.mxu3 %v632_v51 }
 0x10b   : > { %v615_v54 = vadd.f32 %v614_v53, %v565_v52 }
 0x10d   : > { %745 = vmatmul.f32.gmra.mxu2 %v615_v54 }
 0x111   : > { %v567_v55 = vpop.f32.mrf.mxu0 }
 0x112   : > { %v616_v56 = vpop.f32.mrf.mxu1 }
 0x113   : > { %v617_v57 = vadd.f32 %v616_v56, %v567_v55 }
 0x115   : > { %748 = vmatmul.f32.gmra.mxu2 %v617_v57 }
 0x119   : > { %v570_v58 = vpop.f32.mrf.mxu0 }
 0x11a   : > { %v619_v59 = vpop.f32.mrf.mxu1 }
 0x11b   : > { %v620_v60 = vadd.f32 %v619_v59, %v570_v58 }
 0x11d   : > { %751 = vmatmul.f32.gmra.mxu2 %v620_v60 }
 0x121   : > { %v572_v61 = vpop.f32.mrf.mxu0 }
 0x122   : > { %v621_v62 = vpop.f32.mrf.mxu1 }
 0x123   : > { %v622_v63 = vadd.f32 %v621_v62, %v572_v61 }
 0x125   : > { %754 = vmatmul.f32.gmra.mxu2 %v622_v63 }
 0x150   : > { %v722_v1 = vpop.f32.mrf.mxu2 }
 0x151   : > { %v723_v2 = vadd.f32 %v1211_v0, %v722_v1 }
 0x153   : > { %770 = vst [vmem:[%s1578_s24] sm:$0xff] %v723_v2 }
 0x158   : > { %v725_v3 = vpop.f32.mrf.mxu2 }
 0x159   : > { %v726_v4 = vadd.f32 %v1211_v0, %v725_v3 }
 0x15b   : > { %771 = vst [vmem:[%s1578_s24 + $0x8] sm:$0xff] %v726_v4 }
 0x160   : > { %v728_v5 = vpop.f32.mrf.mxu2 }
 0x161   : > { %v729_v6 = vadd.f32 %v1211_v0, %v728_v5 }
 0x163   : > { %772 = vst [vmem:[%s1578_s24 + $0x10] sm:$0xff] %v729_v6 }
 0x168   : > { %v731_v7 = vpop.f32.mrf.mxu2 }
 0x169   : > { %v732_v8 = vadd.f32 %v1211_v0, %v731_v7 }
 0x16b   : > { %773 = vst [vmem:[%s1578_s24 + $0x18] sm:$0xff] %v732_v8 }
 0x170   : > { %v734_v9 = vpop.f32.mrf.mxu2 }
 0x171   : > { %v735_v10 = vadd.f32 %v1211_v0, %v734_v9 }
 0x173   : > { %774 = vst [vmem:[%s1578_s24 + $0x20] sm:$0xff] %v735_v10 }
 0x175   : > { %v758_v11 = vpop.f32.mrf.mxu3 }
 0x176   : > { %v759_v12 = vadd.f32 %v1211_v0, %v758_v11 }
 0x178   : > { %782 = vst [vmem:[%s1578_s24 + $0x60] sm:$0xff] %v759_v12  ;;  %v737_v13 = vpop.f32.mrf.mxu2 }
 0x179   : > { %v738_v14 = vadd.f32 %v1211_v0, %v737_v13 }
 0x17b   : > { %775 = vst [vmem:[%s1578_s24 + $0x28] sm:$0xff] %v738_v14 }
 0x17d   : > { %v761_v15 = vpop.f32.mrf.mxu3 }
 0x17e   : > { %v762_v16 = vadd.f32 %v1211_v0, %v761_v15 }
 0x180   : > { %783 = vst [vmem:[%s1578_s24 + $0x68] sm:$0xff] %v762_v16  ;;  %v740_v17 = vpop.f32.mrf.mxu2 }
 0x181   : > { %v741_v18 = vadd.f32 %v1211_v0, %v740_v17 }
 0x183   : > { %776 = vst [vmem:[%s1578_s24 + $0x30] sm:$0xff] %v741_v18 }
 0x185   : > { %v764_v19 = vpop.f32.mrf.mxu3 }
 0x186   : > { %v765_v20 = vadd.f32 %v1211_v0, %v764_v19 }
 0x188   : > { %784 = vst [vmem:[%s1578_s24 + $0x70] sm:$0xff] %v765_v20  ;;  %v743_v21 = vpop.f32.mrf.mxu2 }
 0x189   : > { %v744_v22 = vadd.f32 %v1211_v0, %v743_v21 }
 0x18b   : > { %777 = vst [vmem:[%s1578_s24 + $0x38] sm:$0xff] %v744_v22 }
 0x18d   : > { %v767_v23 = vpop.f32.mrf.mxu3 }
 0x18e   : > { %v768_v24 = vadd.f32 %v1211_v0, %v767_v23 }
 0x190   : > { %785 = vst [vmem:[%s1578_s24 + $0x78] sm:$0xff] %v768_v24  ;;  %v746_v25 = vpop.f32.mrf.mxu2 }
 0x191   : > { %v747_v26 = vadd.f32 %v1211_v0, %v746_v25 }
 0x193   : > { %778 = vst [vmem:[%s1578_s24 + $0x40] sm:$0xff] %v747_v26 }
 0x198   : > { %v749_v27 = vpop.f32.mrf.mxu2 }
 0x199   : > { %v750_v28 = vadd.f32 %v1211_v0, %v749_v27 }
 0x19b   : > { %779 = vst [vmem:[%s1578_s24 + $0x48] sm:$0xff] %v750_v28 }
 0x1a0   : > { %v752_v29 = vpop.f32.mrf.mxu2 }
 0x1a1   : > { %v753_v30 = vadd.f32 %v1211_v0, %v752_v29 }
 0x1a3   : > { %780 = vst [vmem:[%s1578_s24 + $0x50] sm:$0xff] %v753_v30 }
 0x1a8   : > { %v755_v31 = vpop.f32.mrf.mxu2 }
 0x1a9   : > { %v756_v32 = vadd.f32 %v1211_v0, %v755_v31 }
 0x1ab   : > { %781 = vst [vmem:[%s1578_s24 + $0x58] sm:$0xff] %v756_v32 }
 0x1ac   : > { %1329 = shalt.err (!%p1326_p0)
}
 0x1ad   : > { %s1396_s26 = smov 128   ;;  %s1397_s1 = smov 8  }
 0x1ae   : > { %1132 = dma.vmem_to_hbm [thread:$0]  (%p1502_p2), %s800_s7, 2048, %s802_s8, %s787_s9, %s1396_s26, %s1396_s26, %s1397_s1  }
 0x1af PF: > { %s816_s23 = sand.u32 1, %s1368_s15   ;;  %p1146_p4 = pnand %p912_p10, %p1470_p5 }
 0x1b0   : > { %s817_s24 = scalar_lea.sflag [#allocation5], %s816_s23 }
 0x1b1   : > { %p1147_p6 = pneg %p1146_p4 }
 0x1b3   : > { %1363 = dma.done.wait (%p1147_p6), %s817_s24, 2048  }
 0x1b4   : > { %1365 = vsyncadd (%p1147_p6), %s817_s24, 4294965248  ;;  %s21_s20 = sadd.s32 1, %s1388_s20   ;;  %s1649_s15 = smov %s1372_s16 }
 0x1b5   : > { %p18_p8 = scmp.ge.s32.totalorder %s21_s20, 4   ;;  %s1650_s16 = smov %s1376_s17 }
 0x1b6   : > { %s1651_s17 = smov %s1512_s6  ;;  %s1652_s18 = smov %s1384_s19 }
 0x1b7   : > { %s1653_s19 = smov %s1655_s22  ;;  %20 = sbr.rel (!%p18_p8) target bundleno = 9 (0x9), region = 98 }
 0x1bc   :  { %823 = vsyncpa [#allocation4], 1 }
 0x1bd   :  { %825 = vsyncpa [#allocation4 + $0x1], 1 }
 0x1be   :  { %826 = vsyncpa [#allocation7], 1 }
 0x1bf   :  { %827 = vsyncpa [#allocation5], 1 }
 0x1c0   :  { %829 = vsyncpa [#allocation5 + $0x1], 1 }

</bundles_post_ra>
